<compile_context>
chip_gen: v5e
topology: v5e:2x2
jax: 0.10.0
libtpu: 0.0.40
codegen_flags: <defaults>
</compile_context>

<pallas_src>
import jax
import jax.numpy as jnp
from jax.experimental import pallas as pl
from jax.experimental.pallas import tpu as pltpu

EPS = 1e-5


# --------------------------------------------------------------------------- kernel

def linear_block_kernel(x_ref, w_ref, b_ref, gamma_ref, beta_ref, o_ref):
    # Grid: (j over Dout tiles [parallel], k over Din tiles [arbitrary/reduction]).
    # The output block index (0, j) is constant across k, so o_ref stays resident in
    # VMEM through the whole reduction and doubles as the f32 accumulator.
    k = pl.program_id(1)
    nk = pl.num_programs(1)

    # bf16 x bf16 -> f32 on the MXU.
    contrib = jnp.dot(x_ref[...], w_ref[...], preferred_element_type=jnp.float32)

    @pl.when(k == 0)
    def _():
        o_ref[...] = contrib            # first K step: write (no zero-init pass)

    @pl.when(k > 0)
    def _():
        o_ref[...] += contrib           # remaining K steps: accumulate in place

    @pl.when(k == nk - 1)
    def _():
        # Fused epilogue after full K accumulation: bias + ReLU + BatchNorm.
        # Batch axis is fully resident, so BN stats need no cross-tile reduction.
        y = jnp.maximum(o_ref[...] + b_ref[...], 0.0)        # (B, tn) f32
        mean = jnp.mean(y, axis=0, keepdims=True)            # (1, tn)
        t = y - mean
        var = jnp.mean(t * t, axis=0, keepdims=True)
        scale = jax.lax.rsqrt(var + EPS) * gamma_ref[...]    # fold gamma into inv_std
        o_ref[...] = t * scale + beta_ref[...]


# --------------------------------------------------------------------------- helpers

def _round_up(n, m):
    return ((n + m - 1) // m) * m


def _round_down(n, m):
    return max(m, (n // m) * m)


def _vmem_capacity_bytes():
    try:
        return int(pltpu.get_tpu_info().vmem_capacity_bytes)
    except Exception:
        return 64 * 1024 * 1024          # conservative (v7x per-TC capacity)


def _vmem_estimate(B, tk, tn):
    # Double-buffered bf16 x and W tiles, resident f32 output (+ writeback buffer),
    # and the three (1, tn) f32 param blocks (padded to 8 sublanes, double-buffered).
    return (2 * B * tk * 2
            + 2 * tk * tn * 2
            + 2 * B * tn * 4
            + 3 * 2 * 8 * tn * 4)


def _select_tiles(B, Kp0, Dp0, vmem_cap, tk_max, tn_max):
    budget = int(0.45 * vmem_cap)        # leave ~2x headroom for compiler scratch etc.

    tn = min(tn_max, Dp0)
    if Dp0 >= 256:
        # Keep >= 2 Dout tiles so the "parallel" axis shards across v7x's two TCs.
        tn = min(tn, _round_down(Dp0 // 2, 128))
    tn = max(tn, 128)
    tk = max(128, min(tk_max, Kp0))

    # Shrink tn first (B-resident terms scale with tn), then tk.
    while _vmem_estimate(B, tk, tn) > budget and tn > 128:
        tn = _round_down(tn // 2, 128)
    while _vmem_estimate(B, tk, tn) > budget and tk > 128:
        tk = _round_down(tk // 2, 128)
    return tk, tn


# --------------------------------------------------------------------------- wrapper

def prepare_linear_block_params(w_t, b, gamma, beta, batch_size,
                                *, tk_max=2048, tn_max=1024):
    """One-time (out of the hot path) weight padding / bf16 cast + tile selection.

    w_t: (Din, Dout) f32 — the transposed nn.Linear weight.
    """
    Din, Dout = w_t.shape
    Kp0 = _round_up(Din, 128)
    Dp0 = _round_up(Dout, 128)

    vmem_cap = _vmem_capacity_bytes()
    tk, tn = _select_tiles(batch_size, Kp0, Dp0, vmem_cap, tk_max, tn_max)
    Kp = _round_up(Kp0, tk)
    Dp = _round_up(Dp0, tn)

    w_bf = w_t.astype(jnp.bfloat16)
    if (Kp, Dp) != (Din, Dout):
        w_p = jnp.zeros((Kp, Dp), jnp.bfloat16).at[:Din, :Dout].set(w_bf)
    else:
        w_p = w_bf
    # Padded gamma=1, beta=0, bias=0 -> padded columns stay exactly 0 (no NaNs).
    b_p = jnp.zeros((1, Dp), jnp.float32).at[0, :Dout].set(b.astype(jnp.float32))
    g_p = jnp.ones((1, Dp), jnp.float32).at[0, :Dout].set(gamma.astype(jnp.float32))
    be_p = jnp.zeros((1, Dp), jnp.float32).at[0, :Dout].set(beta.astype(jnp.float32))

    est = _vmem_estimate(batch_size, tk, tn)
    vmem_limit = int(min(int(0.9 * vmem_cap), max(32 * 1024 * 1024, 2 * est)))

    return {
        "w": w_p, "b": b_p, "gamma": g_p, "beta": be_p,
        "din": Din, "dout": Dout, "Kp": Kp, "Dp": Dp, "tk": tk, "tn": tn,
        "vmem_limit": vmem_limit,
    }


def linear_block_apply(x, params):
    """Hot path: pad/cast x (tiny), run the fused kernel, slice padding off."""
    B, Din = x.shape
    assert Din == params["din"], "input feature dim mismatch"
    Kp, Dp = params["Kp"], params["Dp"]
    tk, tn = params["tk"], params["tn"]
    Dout = params["dout"]

    x_bf = x.astype(jnp.bfloat16)
    if Kp != Din:
        x_p = jnp.zeros((B, Kp), jnp.bfloat16).at[:, :Din].set(x_bf)
    else:
        x_p = x_bf

    grid = (Dp // tn, Kp // tk)

    cost = pl.CostEstimate(
        flops=2 * B * Kp * Dp,
        transcendentals=0,
        bytes_accessed=Kp * Dp * 2 + (Dp // tn) * B * Kp * 2 + B * Dp * 4 + 3 * Dp * 4,
    )

    out_padded = pl.pallas_call(
        linear_block_kernel,
        out_shape=jax.ShapeDtypeStruct((B, Dp), jnp.float32),
        grid_spec=pltpu.PrefetchScalarGridSpec(
            num_scalar_prefetch=0,
            grid=grid,
            in_specs=[
                pl.BlockSpec((B, tk), lambda j, k: (0, k)),    # x slab (B resident)
                pl.BlockSpec((tk, tn), lambda j, k: (k, j)),   # W tile (dominant traffic)
                pl.BlockSpec((1, tn), lambda j, k: (0, j)),    # bias
                pl.BlockSpec((1, tn), lambda j, k: (0, j)),    # gamma
                pl.BlockSpec((1, tn), lambda j, k: (0, j)),    # beta
            ],
            out_specs=pl.BlockSpec((B, tn), lambda j, k: (0, j)),
        ),
        compiler_params=pltpu.CompilerParams(
            dimension_semantics=("parallel", "arbitrary"),
            vmem_limit_bytes=params["vmem_limit"],
        ),
        cost_estimate=cost,
    )(x_p, params["w"], params["b"], params["gamma"], params["beta"])

    if Dp != Dout:
        return out_padded[:, :Dout]
    return out_padded


def linear_block_forward(x, w_t, b, gamma, beta, **kwargs):
    """Convenience one-shot API (prepares weights on every call — prefer prepare+apply)."""
    params = prepare_linear_block_params(w_t, b, gamma, beta, x.shape[0], **kwargs)
    return linear_block_apply(x, params)


# --------------------------------------------------------------------------- reference

def reference_forward(x, w_t, b, gamma, beta):
    # Mirrors the kernel's bf16 matmul / f32 accumulation so the comparison is tight.
    # (bf16 operands deviate from PyTorch's f32 nn.Linear — documented tolerance.)
    y = jnp.dot(x.astype(jnp.bfloat16), w_t.astype(jnp.bfloat16),
                preferred_element_type=jnp.float32) + b[None, :]
    y = jnp.maximum(y, 0.0)
    mean = jnp.mean(y, axis=0, keepdims=True)
    var = jnp.mean((y - mean) ** 2, axis=0, keepdims=True)
    return (y - mean) / jnp.sqrt(var + EPS) * gamma[None, :] + beta[None, :]


if __name__ == "__main__":
    B, Din, Dout = 8, 32, 32

    key = jax.random.PRNGKey(0)
    kx, kw, kb, kg, kbe = jax.random.split(key, 5)

    x = jax.random.normal(kx, (B, Din), dtype=jnp.float32)
    # nn.Linear weight is (Dout, Din); pre-transpose to (Din, Dout).
    w = jax.random.normal(kw, (Dout, Din), dtype=jnp.float32) * (1.0 / jnp.sqrt(Din))
    w_t = w.T
    b = jax.random.normal(kb, (Dout,), dtype=jnp.float32) * 0.1
    gamma = 1.0 + 0.1 * jax.random.normal(kg, (Dout,), dtype=jnp.float32)
    beta = 0.1 * jax.random.normal(kbe, (Dout,), dtype=jnp.float32)

    # Weights prepared once (outside the hot path), then applied.
    prepared = prepare_linear_block_params(w_t, b, gamma, beta, batch_size=B)
    out = linear_block_apply(x, prepared)
    out = jax.block_until_ready(out)

    ref = reference_forward(x, w_t, b, gamma, beta)
    assert out.shape == (B, Dout)
    assert jnp.allclose(out, ref, atol=1e-3, rtol=1e-3), "mismatch vs reference"

    print("KERNEL_OK")
</pallas_src>

<mosaic_0001>
module attributes {stable_mosaic.version = 11 : i64} {
  func.func @linear_block_kernel(%arg0: i32, %arg1: i32, %arg2: memref<8x128xbf16, #tpu.memory_space<vmem>>, %arg3: memref<128x128xbf16, #tpu.memory_space<vmem>>, %arg4: memref<1x128xf32, #tpu.memory_space<vmem>>, %arg5: memref<1x128xf32, #tpu.memory_space<vmem>>, %arg6: memref<1x128xf32, #tpu.memory_space<vmem>>, %arg7: memref<8x128xf32, #tpu.memory_space<vmem>>) attributes {dimension_semantics = [#tpu.dimension_semantics<parallel>, #tpu.dimension_semantics<arbitrary>], iteration_bounds = array<i64: 1, 1>, scalar_prefetch = 0 : i64, scratch_operands = 0 : i64, tpu.core_type = #tpu.core_type<tc>, window_params = [{transform_indices = @transform_0, window_bounds = array<i64: 8, 128>}, {transform_indices = @transform_1, window_bounds = array<i64: 128, 128>}, {transform_indices = @transform_2, window_bounds = array<i64: 1, 128>}, {transform_indices = @transform_3, window_bounds = array<i64: 1, 128>}, {transform_indices = @transform_4, window_bounds = array<i64: 1, 128>}, {transform_indices = @transform_5, window_bounds = array<i64: 8, 128>}]} {
    %c0 = arith.constant 0 : index
    %c0_0 = arith.constant 0 : index
    %0 = vector.load %arg2[%c0, %c0_0] : memref<8x128xbf16, #tpu.memory_space<vmem>>, vector<8x128xbf16>
    %c0_1 = arith.constant 0 : index
    %c0_2 = arith.constant 0 : index
    %1 = vector.load %arg3[%c0_1, %c0_2] : memref<128x128xbf16, #tpu.memory_space<vmem>>, vector<128x128xbf16>
    %cst = arith.constant dense<0.000000e+00> : vector<8x128xf32>
    %2 = tpu.matmul %0, %1, %cst {dimension_numbers = #tpu.dot_dimension_numbers<[1], [0], [0], [1], [0, 0, 1, 1], [], []>} : vector<8x128xbf16>, vector<128x128xbf16>, vector<8x128xf32> -> vector<8x128xf32>
    %c0_i32 = arith.constant 0 : i32
    %3 = arith.cmpi eq, %arg1, %c0_i32 : i32
    %4 = arith.extui %3 : i1 to i32
    %c0_i32_3 = arith.constant 0 : i32
    %5 = arith.cmpi ne, %4, %c0_i32_3 : i32
    scf.if %5 {
      %c0_8 = arith.constant 0 : index
      %c0_9 = arith.constant 0 : index
      %12 = vector.load %arg7[%c0_8, %c0_9] : memref<8x128xf32, #tpu.memory_space<vmem>>, vector<8x128xf32>
      tpu.vector_store %arg7[%c0_8, %c0_9], %2 {strides = array<i32>} : memref<8x128xf32, #tpu.memory_space<vmem>>, vector<8x128xf32>,
    } else {
    }
    %c0_i32_4 = arith.constant 0 : i32
    %6 = arith.cmpi sgt, %arg1, %c0_i32_4 : i32
    %7 = arith.extui %6 : i1 to i32
    %c0_i32_5 = arith.constant 0 : i32
    %8 = arith.cmpi ne, %7, %c0_i32_5 : i32
    scf.if %8 {
      %c0_8 = arith.constant 0 : index
      %c0_9 = arith.constant 0 : index
      %12 = vector.load %arg7[%c0_8, %c0_9] : memref<8x128xf32, #tpu.memory_space<vmem>>, vector<8x128xf32>
      %13 = arith.addf %12, %2 : vector<8x128xf32>
      %c0_10 = arith.constant 0 : index
      %c0_11 = arith.constant 0 : index
      %14 = vector.load %arg7[%c0_10, %c0_11] : memref<8x128xf32, #tpu.memory_space<vmem>>, vector<8x128xf32>
      tpu.vector_store %arg7[%c0_10, %c0_11], %13 {strides = array<i32>} : memref<8x128xf32, #tpu.memory_space<vmem>>, vector<8x128xf32>,
    } else {
    }
    %c0_i32_6 = arith.constant 0 : i32
    %9 = arith.cmpi eq, %arg1, %c0_i32_6 : i32
    %10 = arith.extui %9 : i1 to i32
    %c0_i32_7 = arith.constant 0 : i32
    %11 = arith.cmpi ne, %10, %c0_i32_7 : i32
    scf.if %11 {
      %c0_8 = arith.constant 0 : index
      %c0_9 = arith.constant 0 : index
      %12 = vector.load %arg7[%c0_8, %c0_9] : memref<8x128xf32, #tpu.memory_space<vmem>>, vector<8x128xf32>
      %c0_10 = arith.constant 0 : index
      %c0_11 = arith.constant 0 : index
      %13 = vector.load %arg4[%c0_10, %c0_11] : memref<1x128xf32, #tpu.memory_space<vmem>>, vector<1x128xf32>
      %14 = vector.broadcast %13 : vector<1x128xf32> to vector<8x128xf32>
      %15 = arith.addf %12, %14 : vector<8x128xf32>
      %cst_12 = arith.constant 0.000000e+00 : f32
      %16 = vector.broadcast %cst_12 : f32 to vector<8x128xf32>
      %17 = arith.maximumf %15, %16 : vector<8x128xf32>
      %cst_13 = arith.constant dense<0.000000e+00> : vector<128xf32>
      %18 = vector.multi_reduction <add>, %17, %cst_13 [0] : vector<8x128xf32> to vector<128xf32>
      %19 = vector.shape_cast %18 : vector<128xf32> to vector<1x128xf32>
      %cst_14 = arith.constant 8.000000e+00 : f32
      %20 = vector.broadcast %cst_14 : f32 to vector<1x128xf32>
      %21 = arith.divf %19, %20 : vector<1x128xf32>
      %22 = vector.broadcast %21 : vector<1x128xf32> to vector<8x128xf32>
      %23 = arith.subf %17, %22 : vector<8x128xf32>
      %24 = arith.mulf %23, %23 : vector<8x128xf32>
      %cst_15 = arith.constant dense<0.000000e+00> : vector<128xf32>
      %25 = vector.multi_reduction <add>, %24, %cst_15 [0] : vector<8x128xf32> to vector<128xf32>
      %26 = vector.shape_cast %25 : vector<128xf32> to vector<1x128xf32>
      %cst_16 = arith.constant 8.000000e+00 : f32
      %27 = vector.broadcast %cst_16 : f32 to vector<1x128xf32>
      %28 = arith.divf %26, %27 : vector<1x128xf32>
      %cst_17 = arith.constant 9.99999974E-6 : f32
      %29 = vector.broadcast %cst_17 : f32 to vector<1x128xf32>
      %30 = arith.addf %28, %29 : vector<1x128xf32>
      %31 = math.rsqrt %30 : vector<1x128xf32>
      %c0_18 = arith.constant 0 : index
      %c0_19 = arith.constant 0 : index
      %32 = vector.load %arg5[%c0_18, %c0_19] : memref<1x128xf32, #tpu.memory_space<vmem>>, vector<1x128xf32>
      %33 = arith.mulf %31, %32 : vector<1x128xf32>
      %34 = vector.broadcast %33 : vector<1x128xf32> to vector<8x128xf32>
      %35 = arith.mulf %23, %34 : vector<8x128xf32>
      %c0_20 = arith.constant 0 : index
      %c0_21 = arith.constant 0 : index
      %36 = vector.load %arg6[%c0_20, %c0_21] : memref<1x128xf32, #tpu.memory_space<vmem>>, vector<1x128xf32>
      %37 = vector.broadcast %36 : vector<1x128xf32> to vector<8x128xf32>
      %38 = arith.addf %35, %37 : vector<8x128xf32>
      %c0_22 = arith.constant 0 : index
      %c0_23 = arith.constant 0 : index
      %39 = vector.load %arg7[%c0_22, %c0_23] : memref<8x128xf32, #tpu.memory_space<vmem>>, vector<8x128xf32>
      tpu.vector_store %arg7[%c0_22, %c0_23], %38 {strides = array<i32>} : memref<8x128xf32, #tpu.memory_space<vmem>>, vector<8x128xf32>,
    } else {
    }
    return
  }
  func.func @transform_0(%arg0: i32, %arg1: i32) -> (i32, i32) {
    %c0_i32 = arith.constant 0 : i32
    %c0_i32_0 = arith.constant 0 : i32
    return %c0_i32, %arg1 : i32, i32
  }
  func.func @transform_1(%arg0: i32, %arg1: i32) -> (i32, i32) {
    %c0_i32 = arith.constant 0 : i32
    return %arg1, %arg0 : i32, i32
  }
  func.func @transform_2(%arg0: i32, %arg1: i32) -> (i32, i32) {
    %c0_i32 = arith.constant 0 : i32
    %c0_i32_0 = arith.constant 0 : i32
    return %c0_i32, %arg0 : i32, i32
  }
  func.func @transform_3(%arg0: i32, %arg1: i32) -> (i32, i32) {
    %c0_i32 = arith.constant 0 : i32
    %c0_i32_0 = arith.constant 0 : i32
    return %c0_i32, %arg0 : i32, i32
  }
  func.func @transform_4(%arg0: i32, %arg1: i32) -> (i32, i32) {
    %c0_i32 = arith.constant 0 : i32
    %c0_i32_0 = arith.constant 0 : i32
    return %c0_i32, %arg0 : i32, i32
  }
  func.func @transform_5(%arg0: i32, %arg1: i32) -> (i32, i32) {
    %c0_i32 = arith.constant 0 : i32
    %c0_i32_0 = arith.constant 0 : i32
    return %c0_i32, %arg0 : i32, i32
  }
}

</mosaic_0001>

<bundles_post_ra>
// kernel: tpu_custom_call.1
= control target key start
LH: loop header
LB: loop body
LE: loop exit
PB: predicated region body
PF: predicated region fallthrough
CT: control target
= control target key end

     0   :  { %10 = vsyncpa [#allocation3], 0  ;;  %s397_s0 = inlined_call_operand.hbm [shape: bf16[8,128], index: 0, kind: input, shape index: {}]   ;;  %s398_s1 = inlined_call_operand.hbm [shape: bf16[128,128], index: 1, kind: input, shape index: {}]   ;;  %s399_s2 = inlined_call_operand.vmem [shape: f32[1,128], index: 2, kind: input, shape index: {}]   ;;  %s400_s3 = inlined_call_operand.vmem [shape: f32[1,128], index: 3, kind: input, shape index: {}]   ;;  %s401_s4 = inlined_call_operand.vmem [shape: f32[1,128], index: 4, kind: input, shape index: {}]   ;;  %s402_s5 = inlined_call_operand.hbm [shape: f32[8,128], index: 5, kind: output, shape index: {}]  }
   0x1   :  { %11 = vsyncpa [#allocation6], 0 }
   0x2   :  { %12 = vsyncpa [#allocation4], 0  ;;  %s18_s20 = sshll.u32 %s397_s0, 4  ;;  %s343_s21 = smov [#allocation2]   ;;  %s19_s20 = int_to_ptr.hbm [resolvable:$true] %s18_s20 }
   0x3   :  { %s20_s22 = sshll.u32 %s343_s21, 4  ;;  %s28_s25 = sshll.u32 %s398_s1, 4  ;;  %s21_s22 = int_to_ptr.vmem [resolvable:$true] %s20_s22  ;;  %s29_s25 = int_to_ptr.hbm [resolvable:$true] %s28_s25 }
   0x4   :  { %23 = dma.hbm_to_vmem [thread:$0]  %s19_s20, 64, %s21_s22, [#allocation3]  }
   0x5   :  { %s344_s26 = smov [#allocation5]   ;;  %s345_s28 = smov 64  }
   0x6   :  { %s30_s27 = sshll.u32 %s344_s26, 4  ;;  %s346_s29 = smov 4   ;;  %s31_s27 = int_to_ptr.vmem [resolvable:$true] %s30_s27 }
   0x7   :  { %36 = dma.hbm_to_vmem [thread:$0]  %s29_s25, 1024, %s31_s27, [#allocation6], %s345_s28, %s345_s28, %s346_s29  }
   0x8   :  { %337 = dma.done.wait [#allocation3], 64  }
   0x9   :  { %338 = vsyncadd [#allocation3], 4294967232 }
   0xa   :  { %339 = dma.done.wait [#allocation6], 1024  }
   0xb   :  { %340 = vsyncadd [#allocation6], 4294966272  ;;  %v252_v0 = vld [vmem:[#allocation5 + $0x38] sm:$0xff]  ;;  %v251_v1 = vld [vmem:[#allocation5 + $0x30] sm:$0xff]  ;;  %v347_v9 = vmov 8.0   ;;  %s348_s8 = smov [#allocation7]  }
   0xc   :  { %116 = vmatpush.bf16.msra.mxu0 %v252_v0  ;;  %v250_v2 = vld [vmem:[#allocation5 + $0x28] sm:$0xff]  ;;  %v249_v3 = vld [vmem:[#allocation5 + $0x20] sm:$0xff]  ;;  %v248_v4 = vld [vmem:[#allocation5 + $0x18] sm:$0xff]  ;;  %261 = vrcp.f32 %v347_v9  ;;  %s200_s9 = sshll.u32 %s348_s8, 4  ;;  %s202_s12 = sshll.u32 %s402_s5, 4  ;;  %s201_s9 = int_to_ptr.vmem [resolvable:$true] %s200_s9  ;;  %s203_s12 = int_to_ptr.hbm [resolvable:$true] %s202_s12 }
   0xd   :  { %v247_v5 = vld [vmem:[#allocation5 + $0x10] sm:$0xff]  ;;  %v246_v6 = vld [vmem:[#allocation5 + $0x8] sm:$0xff]  ;;  %v245_v7 = vld [vmem:[#allocation5] sm:$0xff] }
   0xe   :  { %v51_v8 = vld [vmem:[#allocation2] sm:$0xf] }
   0xf   :  { %v259_v11 = vld [vmem:[%s399_s2] ss:$0 sm:$0xff] }
  0x10   :  { %117 = vmatpush.bf16.msra.mxu0 %v251_v1  ;;  %v185_v44 = vld [vmem:[%s400_s3] sm:$0x1] }
  0x11   :  { %v260_v48 = vld [vmem:[%s401_s4] ss:$0 sm:$0xff] }
  0x12   :  { %v262_v10 = vpop.eup %261 }
  0x13   :  { %v158_v12 = vmul.f32 8.0, %v262_v10  ;;  %vm162_vm0 = vweird.f32 %v262_v10 }
  0x14   :  { %118 = vmatpush.bf16.msra.mxu0 %v250_v2 }
  0x15   :  { %v159_v15 = vsub.f32 1.0, %v158_v12 }
  0x17   :  { %v160_v18 = vmul.f32 %v262_v10, %v159_v15 }
  0x18   :  { %119 = vmatpush.bf16.msra.mxu0 %v249_v3 }
  0x19   :  { %v161_v22 = vadd.f32 %v262_v10, %v160_v18 }
  0x1b   :  { %v163_v25 = vsel %vm162_vm0, %v262_v10, %v161_v22 }
  0x1c   :  { %120 = vmatpush.bf16.msra.mxu0 %v248_v4 }
  0x20   :  { %121 = vmatpush.bf16.msra.mxu0 %v247_v5 }
  0x24   :  { %122 = vmatpush.bf16.msra.mxu0 %v246_v6 }
  0x28   :  { %123 = vmatpush.bf16.msra.mxu0 %v245_v7 }
  0x2b   :  { %124 = vmatmul.bf16.vlgmr.msra.gmra.mxu0 %v51_v8 }
  0xa8   :  { %v125_v13 = vpop.f32.mrf.mxu0 }
  0xa9   :  { %v149_v14 = vadd.f32 %v259_v11, %v125_v13 }
  0xab   :  { %v150_v16 = vmax.f32 %v149_v14, 0.0 }
  0xad   :  { %v151_v17 = vrot.slane %v150_v16, 4 }
  0xaf   :  { %v152_v19 = vadd.f32 %v151_v17, %v150_v16 }
  0xb0   :  { %v127_v20 = vpop.f32.mrf.mxu0 }
  0xb1   :  { %v153_v21 = vrot.slane %v152_v19, 2 }
  0xb3   :  { %v154_v23 = vadd.f32 %v153_v21, %v152_v19 }
  0xb5   :  { %v155_v24 = vrot.slane %v154_v23, 1 }
  0xb7   :  { %v156_v26 = vadd.f32 %v155_v24, %v154_v23 }
  0xb9   :  { %v164_v27 = vmul.f32 %v163_v25, %v156_v26 }
  0xbb   :  { %v165_v28 = vsub.f32 %v150_v16, %v164_v27 }
  0xbd   :  { %v166_v29 = vmul.f32 %v165_v28, %v165_v28 }
  0xbf   :  { %v167_v30 = vrot.slane %v166_v29, 4 }
  0xc1   :  { %v168_v31 = vadd.f32 %v167_v30, %v166_v29 }
  0xc3   :  { %v169_v32 = vrot.slane %v168_v31, 2 }
  0xc5   :  { %v170_v33 = vadd.f32 %v169_v32, %v168_v31 }
  0xc7   :  { %v171_v34 = vrot.slane %v170_v33, 1 }
  0xc9   :  { %v172_v35 = vadd.f32 %v171_v34, %v170_v33 }
  0xcb   :  { %v173_v36 = vmul.f32 %v172_v35, %v163_v25 }
  0xcd   :  { %v174_v37 = vadd.f32 1e-05, %v173_v36 }
  0xcf   :  { %263 = vrsqrt.f32 %v174_v37  ;;  %vm181_vm2 = vweird.f32 %v174_v37 }
  0xd5   :  { %v264_v38 = vpop.eup %263 }
  0xd6   :  { %v176_v39 = vmul.f32 %v264_v38, %v174_v37  ;;  %vm182_vm1 = vweird.f32 %v264_v38 }
  0xd7   :  { %vm183_vm3 = vmor %vm181_vm2, %vm182_vm1 }
  0xd8   :  { %v177_v40 = vmul.f32 %v264_v38, %v176_v39 }
  0xda   :  { %v178_v41 = vmul.f32 0.5, %v177_v40 }
  0xdc   :  { %v179_v42 = vsub.f32 1.5, %v178_v41 }
  0xde   :  { %v180_v43 = vmul.f32 %v264_v38, %v179_v42 }
  0xe0   :  { %v184_v45 = vsel %vm183_vm3, %v264_v38, %v180_v43 }
  0xe1   :  { %v186_v46 = vmul.f32 %v185_v44, %v184_v45 }
  0xe3   :  { %v187_v47 = vperm.slane %v186_v46, 0 }
  0xe5   :  { %v188_v49 = vmul.f32 %v187_v47, %v165_v28 }
  0xe7   :  { %v193_v50 = vadd.f32 %v260_v48, %v188_v49 }
  0xe9   :  { %194 = vst [vmem:[#allocation7] sm:$0xff] %v193_v50 }
  0xea   :  { %205 = dma.vmem_to_hbm [thread:$0]  %s201_s9, 128, %s203_s12, [#allocation4]  }
  0xeb   :  { %341 = dma.done.wait [#allocation4], 128  }
  0xec   :  { %342 = vsyncadd [#allocation4], 4294967168 }
  0xed   :  { %210 = vsyncpa [#allocation3], 1 }
  0xee   :  { %211 = vsyncpa [#allocation6], 1 }
  0xef   :  { %212 = vsyncpa [#allocation4], 1 }

</bundles_post_ra>
